<compile_context>
chip_gen: v5e
topology: v5e:2x2
jax: 0.10.0
libtpu: 0.0.40
codegen_flags: <defaults>
</compile_context>

<pallas_src>
from functools import partial

import jax
import jax.numpy as jnp
from jax.experimental import pallas as pl
from jax.experimental.pallas import tpu as pltpu


def _round_up(x, m):
    return ((x + m - 1) // m) * m


def _actor_kernel(x_ref, w1_ref, b1_ref, w2_ref, b2_ref, w3_ref, b3_ref,
                  scale_ref, bias_ref, out_ref):
    # Natural layout: (batch_tile, features).  Each output row depends only on the
    # matching input row, so the ragged last tile is safe under Pallas masking.
    x = x_ref[...]                                                   # (TB, S)

    # Layer 1: (TB, S) @ (S, 64) -> (TB, 64), ReLU on the VPU.
    h = jnp.dot(x, w1_ref[...], preferred_element_type=jnp.float32) + b1_ref[...]
    h = jnp.maximum(h, 0.0)

    # Layer 2: (TB, 64) @ (64, 32) -> (TB, 32), ReLU.
    h = jnp.dot(h, w2_ref[...], preferred_element_type=jnp.float32) + b2_ref[...]
    h = jnp.maximum(h, 0.0)

    # Head: (TB, 32) @ (32, A) -> (TB, A), tanh on the EUP, per-dim affine rescale.
    m = jnp.dot(h, w3_ref[...], preferred_element_type=jnp.float32) + b3_ref[...]
    out_ref[...] = (jnp.tanh(m) * scale_ref[...] + bias_ref[...]).astype(out_ref.dtype)


@partial(jax.jit, static_argnames=("block_batch",))
def deterministic_actor_forward(state, params, *, block_batch=2048):
    """state: (B, state_dim) f32.

    params: torch-layout weights w{1,2,3}: (out_features, in_features),
    biases b{1,2,3}: (out_features,), action_scale / action_bias: scalar or
    (action_dim,).  Returns (B, action_dim) f32.
    """
    batch, state_dim = state.shape
    w1 = params["w1"].astype(jnp.float32)            # (64, S)
    w2 = params["w2"].astype(jnp.float32)            # (32, 64)
    w3 = params["w3"].astype(jnp.float32)            # (A, 32)
    h1_dim, h2_dim, action_dim = w1.shape[0], w2.shape[0], w3.shape[0]

    # Tiny one-time transposes so the kernel computes X @ W (batch stays untouched).
    w1t, w2t, w3t = w1.T, w2.T, w3.T                 # (S,64), (64,32), (32,A)
    b1 = params["b1"].astype(jnp.float32).reshape(1, h1_dim)
    b2 = params["b2"].astype(jnp.float32).reshape(1, h2_dim)
    b3 = params["b3"].astype(jnp.float32).reshape(1, action_dim)
    scale = jnp.broadcast_to(
        params["action_scale"].astype(jnp.float32).reshape(-1), (action_dim,)
    ).reshape(1, action_dim)
    bias = jnp.broadcast_to(
        params["action_bias"].astype(jnp.float32).reshape(-1), (action_dim,)
    ).reshape(1, action_dim)

    # Batch tile on the sublane axis: multiple of 8, capped by block_batch.
    tb = _round_up(min(block_batch, batch), 8)
    grid = (pl.cdiv(batch, tb),)

    # Weights / biases / scale / bias: same block every step -> VMEM-resident.
    def resident(shape):
        return pl.BlockSpec(shape, lambda i: (0, 0))

    flops = 2 * batch * (state_dim * h1_dim + h1_dim * h2_dim + h2_dim * action_dim)
    bytes_accessed = 4 * (
        batch * state_dim + batch * action_dim
        + w1.size + w2.size + w3.size
        + h1_dim + h2_dim + action_dim + 2 * action_dim)

    out = pl.pallas_call(
        _actor_kernel,
        out_shape=jax.ShapeDtypeStruct((batch, action_dim), jnp.float32),
        grid=grid,
        in_specs=[
            pl.BlockSpec((tb, state_dim), lambda i: (i, 0)),   # state tile
            resident((state_dim, h1_dim)),                     # w1^T
            resident((1, h1_dim)),                             # b1
            resident((h1_dim, h2_dim)),                        # w2^T
            resident((1, h2_dim)),                             # b2
            resident((h2_dim, action_dim)),                    # w3^T
            resident((1, action_dim)),                         # b3
            resident((1, action_dim)),                         # action_scale
            resident((1, action_dim)),                         # action_bias
        ],
        out_specs=pl.BlockSpec((tb, action_dim), lambda i: (i, 0)),
        compiler_params=pltpu.CompilerParams(
            dimension_semantics=("parallel",)),
        cost_estimate=pl.CostEstimate(
            flops=flops,
            transcendentals=batch * action_dim,
            bytes_accessed=bytes_accessed),
    )(
        state.astype(jnp.float32),
        w1t, b1, w2t, b2, w3t, b3, scale, bias,
    )
    return out


def init_params(key, state_dim, action_dim):
    """Matches the torch module's weight_init: xavier_uniform(gain=1) weights,
    zero biases; action_space=None -> scale 1.0, bias 0.0 (stored per-dim)."""
    def xavier(k, fan_out, fan_in):
        bound = jnp.sqrt(6.0 / (fan_in + fan_out))
        # torch layout: (out_features, in_features)
        return jax.random.uniform(k, (fan_out, fan_in), jnp.float32, -bound, bound)

    k1, k2, k3 = jax.random.split(key, 3)
    return {
        "w1": xavier(k1, 64, state_dim),
        "b1": jnp.zeros((64,), jnp.float32),
        "w2": xavier(k2, 32, 64),
        "b2": jnp.zeros((32,), jnp.float32),
        "w3": xavier(k3, action_dim, 32),
        "b3": jnp.zeros((action_dim,), jnp.float32),
        # action_space is None in the reference -> scale 1.0, bias 0.0
        # (stored per action dim so real Box spaces are handled correctly).
        "action_scale": jnp.ones((action_dim,), jnp.float32),
        "action_bias": jnp.zeros((action_dim,), jnp.float32),
    }


if __name__ == "__main__":
    state_dim, action_dim, batch = 16, 4, 8
    key = jax.random.PRNGKey(0)
    k_param, k_state = jax.random.split(key)

    params = init_params(k_param, state_dim, action_dim)
    state = jax.random.normal(k_state, (batch, state_dim), jnp.float32)

    mean = deterministic_actor_forward(state, params)
    jax.block_until_ready(mean)

    # Pure-JAX reference of the same forward (torch-layout weights).
    def ref(x, p):
        a = jnp.maximum(x @ p["w1"].T + p["b1"], 0.0)
        a = jnp.maximum(a @ p["w2"].T + p["b2"], 0.0)
        return jnp.tanh(a @ p["w3"].T + p["b3"]) * p["action_scale"] + p["action_bias"]

    expected = ref(state, params)
    assert mean.shape == (batch, action_dim)
    assert jnp.allclose(mean, expected, atol=1e-5), "mismatch vs reference"
    print("KERNEL_OK")
</pallas_src>

<mosaic_0001>
module attributes {stable_mosaic.version = 11 : i64} {
  func.func @_actor_kernel(%arg0: i32, %arg1: memref<8x16xf32, #tpu.memory_space<vmem>>, %arg2: memref<16x64xf32, #tpu.memory_space<vmem>>, %arg3: memref<1x64xf32, #tpu.memory_space<vmem>>, %arg4: memref<64x32xf32, #tpu.memory_space<vmem>>, %arg5: memref<1x32xf32, #tpu.memory_space<vmem>>, %arg6: memref<32x4xf32, #tpu.memory_space<vmem>>, %arg7: memref<1x4xf32, #tpu.memory_space<vmem>>, %arg8: memref<1x4xf32, #tpu.memory_space<vmem>>, %arg9: memref<1x4xf32, #tpu.memory_space<vmem>>, %arg10: memref<8x4xf32, #tpu.memory_space<vmem>>) attributes {dimension_semantics = [#tpu.dimension_semantics<parallel>], iteration_bounds = array<i64: 1>, scalar_prefetch = 0 : i64, scratch_operands = 0 : i64, tpu.core_type = #tpu.core_type<tc>, window_params = [{transform_indices = @transform_0, window_bounds = array<i64: 8, 16>}, {pipeline_mode = #tpu.pipeline_mode<synchronous>, transform_indices = @transform_1, window_bounds = array<i64: 16, 64>}, {pipeline_mode = #tpu.pipeline_mode<synchronous>, transform_indices = @transform_2, window_bounds = array<i64: 1, 64>}, {pipeline_mode = #tpu.pipeline_mode<synchronous>, transform_indices = @transform_3, window_bounds = array<i64: 64, 32>}, {pipeline_mode = #tpu.pipeline_mode<synchronous>, transform_indices = @transform_4, window_bounds = array<i64: 1, 32>}, {pipeline_mode = #tpu.pipeline_mode<synchronous>, transform_indices = @transform_5, window_bounds = array<i64: 32, 4>}, {pipeline_mode = #tpu.pipeline_mode<synchronous>, transform_indices = @transform_6, window_bounds = array<i64: 1, 4>}, {pipeline_mode = #tpu.pipeline_mode<synchronous>, transform_indices = @transform_7, window_bounds = array<i64: 1, 4>}, {pipeline_mode = #tpu.pipeline_mode<synchronous>, transform_indices = @transform_8, window_bounds = array<i64: 1, 4>}, {transform_indices = @transform_9, window_bounds = array<i64: 8, 4>}]} {
    %c0 = arith.constant 0 : index
    %c0_0 = arith.constant 0 : index
    %0 = vector.load %arg1[%c0, %c0_0] : memref<8x16xf32, #tpu.memory_space<vmem>>, vector<8x16xf32>
    %c0_1 = arith.constant 0 : index
    %c0_2 = arith.constant 0 : index
    %1 = vector.load %arg2[%c0_1, %c0_2] : memref<16x64xf32, #tpu.memory_space<vmem>>, vector<16x64xf32>
    %cst = arith.constant dense<0.000000e+00> : vector<8x64xf32>
    %2 = tpu.matmul %0, %1, %cst {dimension_numbers = #tpu.dot_dimension_numbers<[1], [0], [0], [1], [0, 0, 1, 1], [], []>} : vector<8x16xf32>, vector<16x64xf32>, vector<8x64xf32> -> vector<8x64xf32>
    %c0_3 = arith.constant 0 : index
    %c0_4 = arith.constant 0 : index
    %3 = vector.load %arg3[%c0_3, %c0_4] : memref<1x64xf32, #tpu.memory_space<vmem>>, vector<1x64xf32>
    %4 = vector.broadcast %3 : vector<1x64xf32> to vector<8x64xf32>
    %5 = arith.addf %2, %4 : vector<8x64xf32>
    %cst_5 = arith.constant 0.000000e+00 : f32
    %6 = vector.broadcast %cst_5 : f32 to vector<8x64xf32>
    %7 = arith.maximumf %5, %6 : vector<8x64xf32>
    %c0_6 = arith.constant 0 : index
    %c0_7 = arith.constant 0 : index
    %8 = vector.load %arg4[%c0_6, %c0_7] : memref<64x32xf32, #tpu.memory_space<vmem>>, vector<64x32xf32>
    %cst_8 = arith.constant dense<0.000000e+00> : vector<8x32xf32>
    %9 = tpu.matmul %7, %8, %cst_8 {dimension_numbers = #tpu.dot_dimension_numbers<[1], [0], [0], [1], [0, 0, 1, 1], [], []>} : vector<8x64xf32>, vector<64x32xf32>, vector<8x32xf32> -> vector<8x32xf32>
    %c0_9 = arith.constant 0 : index
    %c0_10 = arith.constant 0 : index
    %10 = vector.load %arg5[%c0_9, %c0_10] : memref<1x32xf32, #tpu.memory_space<vmem>>, vector<1x32xf32>
    %11 = vector.broadcast %10 : vector<1x32xf32> to vector<8x32xf32>
    %12 = arith.addf %9, %11 : vector<8x32xf32>
    %cst_11 = arith.constant 0.000000e+00 : f32
    %13 = vector.broadcast %cst_11 : f32 to vector<8x32xf32>
    %14 = arith.maximumf %12, %13 : vector<8x32xf32>
    %c0_12 = arith.constant 0 : index
    %c0_13 = arith.constant 0 : index
    %15 = vector.load %arg6[%c0_12, %c0_13] : memref<32x4xf32, #tpu.memory_space<vmem>>, vector<32x4xf32>
    %cst_14 = arith.constant dense<0.000000e+00> : vector<8x4xf32>
    %16 = tpu.matmul %14, %15, %cst_14 {dimension_numbers = #tpu.dot_dimension_numbers<[1], [0], [0], [1], [0, 0, 1, 1], [], []>} : vector<8x32xf32>, vector<32x4xf32>, vector<8x4xf32> -> vector<8x4xf32>
    %c0_15 = arith.constant 0 : index
    %c0_16 = arith.constant 0 : index
    %17 = vector.load %arg7[%c0_15, %c0_16] : memref<1x4xf32, #tpu.memory_space<vmem>>, vector<1x4xf32>
    %18 = vector.broadcast %17 : vector<1x4xf32> to vector<8x4xf32>
    %19 = arith.addf %16, %18 : vector<8x4xf32>
    %20 = math.tanh %19 : vector<8x4xf32>
    %c0_17 = arith.constant 0 : index
    %c0_18 = arith.constant 0 : index
    %21 = vector.load %arg8[%c0_17, %c0_18] : memref<1x4xf32, #tpu.memory_space<vmem>>, vector<1x4xf32>
    %22 = vector.broadcast %21 : vector<1x4xf32> to vector<8x4xf32>
    %23 = arith.mulf %20, %22 : vector<8x4xf32>
    %c0_19 = arith.constant 0 : index
    %c0_20 = arith.constant 0 : index
    %24 = vector.load %arg9[%c0_19, %c0_20] : memref<1x4xf32, #tpu.memory_space<vmem>>, vector<1x4xf32>
    %25 = vector.broadcast %24 : vector<1x4xf32> to vector<8x4xf32>
    %26 = arith.addf %23, %25 : vector<8x4xf32>
    %c0_21 = arith.constant 0 : index
    %c0_22 = arith.constant 0 : index
    %27 = vector.load %arg10[%c0_21, %c0_22] : memref<8x4xf32, #tpu.memory_space<vmem>>, vector<8x4xf32>
    tpu.vector_store %arg10[%c0_21, %c0_22], %26 {strides = array<i32>} : memref<8x4xf32, #tpu.memory_space<vmem>>, vector<8x4xf32>,
    return
  }
  func.func @transform_0(%arg0: i32) -> (i32, i32) {
    %c0_i32 = arith.constant 0 : i32
    %c0_i32_0 = arith.constant 0 : i32
    return %arg0, %c0_i32 : i32, i32
  }
  func.func @transform_1(%arg0: i32) -> (i32, i32) {
    %c0_i32 = arith.constant 0 : i32
    %c0_i32_0 = arith.constant 0 : i32
    %c0_i32_1 = arith.constant 0 : i32
    return %c0_i32, %c0_i32_0 : i32, i32
  }
  func.func @transform_2(%arg0: i32) -> (i32, i32) {
    %c0_i32 = arith.constant 0 : i32
    %c0_i32_0 = arith.constant 0 : i32
    %c0_i32_1 = arith.constant 0 : i32
    return %c0_i32, %c0_i32_0 : i32, i32
  }
  func.func @transform_3(%arg0: i32) -> (i32, i32) {
    %c0_i32 = arith.constant 0 : i32
    %c0_i32_0 = arith.constant 0 : i32
    %c0_i32_1 = arith.constant 0 : i32
    return %c0_i32, %c0_i32_0 : i32, i32
  }
  func.func @transform_4(%arg0: i32) -> (i32, i32) {
    %c0_i32 = arith.constant 0 : i32
    %c0_i32_0 = arith.constant 0 : i32
    %c0_i32_1 = arith.constant 0 : i32
    return %c0_i32, %c0_i32_0 : i32, i32
  }
  func.func @transform_5(%arg0: i32) -> (i32, i32) {
    %c0_i32 = arith.constant 0 : i32
    %c0_i32_0 = arith.constant 0 : i32
    %c0_i32_1 = arith.constant 0 : i32
    return %c0_i32, %c0_i32_0 : i32, i32
  }
  func.func @transform_6(%arg0: i32) -> (i32, i32) {
    %c0_i32 = arith.constant 0 : i32
    %c0_i32_0 = arith.constant 0 : i32
    %c0_i32_1 = arith.constant 0 : i32
    return %c0_i32, %c0_i32_0 : i32, i32
  }
  func.func @transform_7(%arg0: i32) -> (i32, i32) {
    %c0_i32 = arith.constant 0 : i32
    %c0_i32_0 = arith.constant 0 : i32
    %c0_i32_1 = arith.constant 0 : i32
    return %c0_i32, %c0_i32_0 : i32, i32
  }
  func.func @transform_8(%arg0: i32) -> (i32, i32) {
    %c0_i32 = arith.constant 0 : i32
    %c0_i32_0 = arith.constant 0 : i32
    %c0_i32_1 = arith.constant 0 : i32
    return %c0_i32, %c0_i32_0 : i32, i32
  }
  func.func @transform_9(%arg0: i32) -> (i32, i32) {
    %c0_i32 = arith.constant 0 : i32
    %c0_i32_0 = arith.constant 0 : i32
    return %arg0, %c0_i32 : i32, i32
  }
}

</mosaic_0001>

<bundles_post_ra>
// kernel: deterministic_actor_forward.1
= control target key start
LH: loop header
LB: loop body
LE: loop exit
PB: predicated region body
PF: predicated region fallthrough
CT: control target
= control target key end

     0   :  { %vm39_vm0 = vcmask 130048   ;;  %vm76_vm1 = vcmask 523264   ;;  %vm109_vm2 = vcmask 261120   ;;  %vm144_vm3 = vcmask 31744   ;;  %s273_s1 = inlined_call_operand.vmem [shape: f32[16,64], index: 1, kind: input, shape index: {}]   ;;  %s274_s0 = inlined_call_operand.vmem [shape: f32[8,16], index: 0, kind: input, shape index: {}]   ;;  %s275_s3 = inlined_call_operand.vmem [shape: f32[64,32], index: 3, kind: input, shape index: {}]   ;;  %s276_s2 = inlined_call_operand.vmem [shape: f32[1,64], index: 2, kind: input, shape index: {}]   ;;  %s277_s4 = inlined_call_operand.vmem [shape: f32[1,32], index: 4, kind: input, shape index: {}]   ;;  %s278_s5 = inlined_call_operand.vmem [shape: f32[32,4], index: 5, kind: input, shape index: {}]   ;;  %s279_s6 = inlined_call_operand.vmem [shape: f32[1,4], index: 6, kind: input, shape index: {}]   ;;  %s280_s7 = inlined_call_operand.vmem [shape: f32[1,4], index: 7, kind: input, shape index: {}]   ;;  %s281_s8 = inlined_call_operand.vmem [shape: f32[1,4], index: 8, kind: input, shape index: {}]   ;;  %s282_s9 = inlined_call_operand.vmem [shape: f32[8,4], index: 9, kind: output, shape index: {}]  }
   0x1   :  { %v34_v0 = vld [vmem:[%s273_s1 + $0x8] sm:$0xff]  ;;  %v33_v1 = vld [vmem:[%s273_s1] sm:$0xff]  ;;  %v71_v3 = vld [vmem:[%s275_s3 + $0x38] sm:$0xff] }
   0x2   :  { %57 = vmatpush.msra.mxu0 %v34_v0  ;;  %v32_v2 = vld [vmem:[%s274_s0] sm:$0xff]  ;;  %v70_v4 = vld [vmem:[%s275_s3 + $0x30] sm:$0xff]  ;;  %88 = vmatpush.msra.mxu1 %v71_v3  ;;  %v69_v5 = vld [vmem:[%s275_s3 + $0x28] sm:$0xff] }
   0x3   :  { %v68_v6 = vld [vmem:[%s275_s3 + $0x20] sm:$0xff]  ;;  %v67_v7 = vld [vmem:[%s275_s3 + $0x18] sm:$0xff]  ;;  %v66_v8 = vld [vmem:[%s275_s3 + $0x10] sm:$0xff] }
   0x4   :  { %58 = vmatpush.msra.mxu0 %v33_v1  ;;  %89 = vmatpush.msra.mxu1 %v70_v4  ;;  %v65_v9 = vld [vmem:[%s275_s3 + $0x8] sm:$0xff]  ;;  %v64_v10 = vld [vmem:[%s275_s3] sm:$0xff]  ;;  %v104_v11 = vld [vmem:[%s278_s5 + $0x18] sm:$0xff] }
   0x5   :  { %150 = vmatmul.msk.f32.vlgmr.msra.gmra.mxu0 %vm39_vm0, %v32_v2  ;;  %125 = vmatpush.msra.mxu2 %v104_v11  ;;  %v153_v12 = vld [vmem:[%s276_s2] ss:$0 sm:$0xff]  ;;  %v103_v16 = vld [vmem:[%s278_s5 + $0x10] sm:$0xff]  ;;  %v102_v17 = vld [vmem:[%s278_s5 + $0x8] sm:$0xff] }
   0x6   :  { %90 = vmatpush.msra.mxu1 %v69_v5  ;;  %v101_v18 = vld [vmem:[%s278_s5] sm:$0xff] }
   0x7   :  { %126 = vmatpush.msra.mxu2 %v103_v16  ;;  %v154_v19 = vld [vmem:[%s277_s4] ss:$0 sm:$0xff] }
   0x8   :  { %91 = vmatpush.msra.mxu1 %v68_v6  ;;  %v155_v23 = vld [vmem:[%s279_s6] ss:$0 sm:$0xff] }
   0x9   :  { %127 = vmatpush.msra.mxu2 %v102_v17  ;;  %v156_v26 = vld [vmem:[%s280_s7] ss:$0 sm:$0xff] }
   0xa   :  { %92 = vmatpush.msra.mxu1 %v67_v7  ;;  %v157_v27 = vld [vmem:[%s281_s8] ss:$0 sm:$0xff] }
   0xb   :  { %128 = vmatpush.msra.mxu2 %v101_v18 }
   0xc   :  { %93 = vmatpush.msra.mxu1 %v66_v8 }
   0xe   :  { %94 = vmatpush.msra.mxu1 %v65_v9 }
  0x10   :  { %95 = vmatpush.msra.mxu1 %v64_v10 }
  0x82   :  { %v60_v13 = vpop.f32.mrf.mxu0 }
  0x83   :  { %v61_v14 = vadd.f32 %v153_v12, %v60_v13 }
  0x85   :  { %v63_v15 = vmax.f32 %v61_v14, 0.0 }
  0x87   :  { %151 = vmatmul.msk.f32.vlgmr.msra.gmra.mxu1 %vm76_vm1, %v63_v15 }
 0x104   :  { %v97_v20 = vpop.f32.mrf.mxu1 }
 0x105   :  { %v98_v21 = vadd.f32 %v154_v19, %v97_v20 }
 0x107   :  { %v100_v22 = vmax.f32 %v98_v21, 0.0 }
 0x109   :  { %152 = vmatmul.msk.f32.vlgmr.msra.gmra.mxu2 %vm109_vm2, %v100_v22 }
 0x18c   :  { %v130_v24 = vpop.f32.mrf.mxu2 }
 0x18d   :  { %v131_v25 = vadd.f32 %v155_v23, %v130_v24 }
 0x18f   :  { %158 = vtanh.f32 %v131_v25 }
 0x195   :  { %v159_v28 = vpop.eup %158 }
 0x196   :  { %v138_v29 = vmul.f32 %v159_v28, %v156_v26 }
 0x198   :  { %v143_v30 = vadd.f32 %v157_v27, %v138_v29 }
 0x19a   :  { %145 = vst.msk [vmem:[%s282_s9] sm:$0xff] %vm144_vm3, %v143_v30 }

</bundles_post_ra>
